<compile_context>
chip_gen: v6e
topology: v6e:2x2x1
jax: 0.10.0
libtpu: 0.0.40
codegen_flags: <defaults>
</compile_context>

<pallas_src>
import functools

import jax
import jax.numpy as jnp
from jax import lax
from jax.experimental import pallas as pl
from jax.experimental.pallas import tpu as pltpu


def _pick_batch_block(n, seq_len, target_tokens=256):
    """Pick Nb (a divisor of N): enough tokens per step to fill the MXU M dim,
    while keeping >=2 grid steps for megacore sharding when possible."""
    divisors = [d for d in range(1, n + 1) if n % d == 0]
    good = [d for d in divisors if d * seq_len >= target_tokens and n // d >= 2]
    if good:
        return min(good)
    good = [d for d in divisors if n // d >= 2]
    if good:
        return max(good)
    return n


# ---------------------------------------------------------------------------
# Fused kernel: Nb batch elements per grid step.
#   x:(Nb,L,E)  gamma/beta:(1,E)  W_inT:(E,3E) bf16  b_in:(1,3E)
#   W_outT:(E,E) bf16  b_out:(1,E)                      ->  y:(Nb,L,E)
# ---------------------------------------------------------------------------
def fused_attention_kernel(x_ref, ln_w_ref, ln_b_ref, w_in_ref, b_in_ref,
                           w_out_ref, b_out_ref, o_ref, o_scratch,
                           *, num_heads, head_dim, batch_block):
    E = num_heads * head_dim
    Nb = batch_block
    L = x_ref.shape[1]

    # --- LayerNorm in f32 (biased variance, eps=1e-5, like torch) ------------
    x = x_ref[...].astype(jnp.float32).reshape(Nb * L, E)     # token-major rows
    mean = jnp.mean(x, axis=-1, keepdims=True)
    var = jnp.mean((x - mean) ** 2, axis=-1, keepdims=True)
    xn = (x - mean) * lax.rsqrt(var + 1e-5)
    xn = xn * ln_w_ref[...] + ln_b_ref[...]                   # (Nb*L, E) f32

    # --- fused QKV projection: bf16 operands, f32 accumulation ---------------
    # 1/sqrt(Dh) is already folded into the Q columns of W_inT / b_in.
    qkv = jnp.dot(xn.astype(jnp.bfloat16), w_in_ref[...],
                  preferred_element_type=jnp.float32)
    qkv = qkv + b_in_ref[...]                                 # (Nb*L, 3E) f32

    # --- SDPA per (batch element, head); static unroll (small Nb*H) ----------
    for b in range(Nb):
        r0, r1 = b * L, (b + 1) * L
        q_b = qkv[r0:r1, 0 * E:1 * E].astype(jnp.bfloat16)    # (L, E)
        k_b = qkv[r0:r1, 1 * E:2 * E].astype(jnp.bfloat16)
        v_b = qkv[r0:r1, 2 * E:3 * E].astype(jnp.bfloat16)
        for h in range(num_heads):
            lo, hi = h * head_dim, (h + 1) * head_dim
            qh, kh, vh = q_b[:, lo:hi], k_b[:, lo:hi], v_b[:, lo:hi]
            # q · kᵀ via dot_general (contract feature dim) — no transpose.
            s = lax.dot_general(qh, kh, (((1,), (1,)), ((), ())),
                                preferred_element_type=jnp.float32)   # (L, L) f32
            s = s - jnp.max(s, axis=-1, keepdims=True)
            p = jnp.exp(s)                                    # unnormalized
            denom = jnp.sum(p, axis=-1, keepdims=True)        # (L, 1), >= 1
            oh = jnp.dot(p.astype(jnp.bfloat16), vh,
                         preferred_element_type=jnp.float32)  # (L, Dh) f32
            # Normalize after the PV matmul: (L,Dh) multiply, EUP reciprocal.
            oh = oh * pl.reciprocal(denom, approx=True)
            o_scratch[r0:r1, lo:hi] = oh                      # scratch accumulate

    # --- output projection: bf16 operands, f32 accumulation ------------------
    o = o_scratch[...].astype(jnp.bfloat16)                   # (Nb*L, E)
    y = jnp.dot(o, w_out_ref[...], preferred_element_type=jnp.float32)
    y = y + b_out_ref[...]
    o_ref[...] = y.reshape(Nb, L, E).astype(o_ref.dtype)


# ---------------------------------------------------------------------------
# One-time parameter preparation (kept OUTSIDE the jitted forward).
# ---------------------------------------------------------------------------
def prepare_params(raw, *, num_heads):
    E = raw["w_out"].shape[0]
    assert E % num_heads == 0
    head_dim = E // num_heads
    scale = 1.0 / (float(head_dim) ** 0.5)

    w_in_t = jnp.asarray(raw["w_in"], jnp.float32).T          # (E, 3E)
    b_in = jnp.asarray(raw["b_in"], jnp.float32).reshape(1, 3 * E)
    # Fold 1/sqrt(Dh) into the Q block of the input projection.
    q_scale = jnp.concatenate([jnp.full((E,), scale, jnp.float32),
                               jnp.ones((2 * E,), jnp.float32)])
    w_in_t = w_in_t * q_scale[None, :]
    b_in = b_in * q_scale[None, :]

    return {
        "ln_w": jnp.asarray(raw["ln_w"], jnp.float32).reshape(1, E),
        "ln_b": jnp.asarray(raw["ln_b"], jnp.float32).reshape(1, E),
        "w_in_t": w_in_t.astype(jnp.bfloat16),                # bf16 MXU operand
        "b_in": b_in,                                         # f32 (added post-acc)
        "w_out_t": jnp.asarray(raw["w_out"], jnp.float32).T.astype(jnp.bfloat16),
        "b_out": jnp.asarray(raw["b_out"], jnp.float32).reshape(1, E),
    }


# ---------------------------------------------------------------------------
# Wrapper
# ---------------------------------------------------------------------------
@functools.partial(jax.jit, static_argnames=("num_heads",))
def attention_forward(x, params, *, num_heads):
    L, N, E = x.shape
    H = num_heads
    Dh = E // H
    Nb = _pick_batch_block(N, L)
    grid_n = N // Nb

    # Batch-first layout once; everything else stays fused in one pallas_call.
    x_nle = jnp.transpose(x, (1, 0, 2))                       # (N, L, E)

    kernel = functools.partial(fused_attention_kernel,
                               num_heads=H, head_dim=Dh, batch_block=Nb)

    # Resident (grid-invariant) weights/biases: single-buffered.
    resident = functools.partial(pl.BlockSpec, pipeline_mode=pl.Buffered(1))

    out = pl.pallas_call(
        kernel,
        grid=(grid_n,),
        in_specs=[
            pl.BlockSpec((Nb, L, E), lambda n: (n, 0, 0)),     # x (Nb batch elems)
            resident((1, E), lambda n: (0, 0)),                # ln gamma
            resident((1, E), lambda n: (0, 0)),                # ln beta
            resident((E, 3 * E), lambda n: (0, 0)),            # W_in^T (bf16)
            resident((1, 3 * E), lambda n: (0, 0)),            # b_in
            resident((E, E), lambda n: (0, 0)),                # W_out^T (bf16)
            resident((1, E), lambda n: (0, 0)),                # b_out
        ],
        out_specs=pl.BlockSpec((Nb, L, E), lambda n: (n, 0, 0)),
        out_shape=jax.ShapeDtypeStruct((N, L, E), jnp.float32),
        scratch_shapes=[pltpu.VMEM((Nb * L, E), jnp.float32)], # head-output accum
        compiler_params=pltpu.CompilerParams(
            dimension_semantics=("parallel",),                 # megacore-friendly
            vmem_limit_bytes=32 * 1024 * 1024,                 # fits v7x 64 MiB phys
        ),
    )(x_nle, params["ln_w"], params["ln_b"], params["w_in_t"], params["b_in"],
      params["w_out_t"], params["b_out"])

    return jnp.transpose(out, (1, 0, 2))                      # back to (L, N, E)


# ---------------------------------------------------------------------------
# Pure-JAX f32 reference (same math, unprepared params) for a sanity check
# ---------------------------------------------------------------------------
def attention_reference(x, raw, *, num_heads):
    L, N, E = x.shape
    H = num_heads
    Dh = E // H
    mean = jnp.mean(x, axis=-1, keepdims=True)
    var = jnp.mean((x - mean) ** 2, axis=-1, keepdims=True)
    xn = (x - mean) / jnp.sqrt(var + 1e-5)
    xn = xn * raw["ln_w"][0] + raw["ln_b"][0]
    qkv = xn.reshape(L * N, E) @ raw["w_in"].T + raw["b_in"][0]

    def split_heads(t):
        return t.reshape(L, N, H, Dh).transpose(1, 2, 0, 3)   # (N,H,L,Dh)

    q = split_heads(qkv[:, :E]) / jnp.sqrt(jnp.float32(Dh))
    k = split_heads(qkv[:, E:2 * E])
    v = split_heads(qkv[:, 2 * E:])
    s = jnp.einsum("nhld,nhmd->nhlm", q, k)
    p = jax.nn.softmax(s, axis=-1)
    o = jnp.einsum("nhlm,nhmd->nhld", p, v)                   # (N,H,L,Dh)
    o = o.transpose(2, 0, 1, 3).reshape(L * N, E)
    y = o @ raw["w_out"].T + raw["b_out"][0]
    return y.reshape(L, N, E)


if __name__ == "__main__":
    # Small shapes: proj_dim=32, num_heads=4, seq=8, batch=2
    E, H, L, N = 32, 4, 8, 2

    key = jax.random.PRNGKey(0)
    k_x, k_win, k_bin, k_wout, k_bout = jax.random.split(key, 5)

    x = jax.random.normal(k_x, (L, N, E), dtype=jnp.float32)

    raw_params = {
        # LayerNorm defaults: weight=1, bias=0
        "ln_w": jnp.ones((1, E), jnp.float32),
        "ln_b": jnp.zeros((1, E), jnp.float32),
        # MultiheadAttention in/out projections (deterministic random init)
        "w_in": 0.1 * jax.random.normal(k_win, (3 * E, E), dtype=jnp.float32),
        "b_in": 0.1 * jax.random.normal(k_bin, (1, 3 * E), dtype=jnp.float32),
        "w_out": 0.1 * jax.random.normal(k_wout, (E, E), dtype=jnp.float32),
        "b_out": 0.1 * jax.random.normal(k_bout, (1, E), dtype=jnp.float32),
    }

    params = prepare_params(raw_params, num_heads=H)           # once, outside jit

    y = attention_forward(x, params, num_heads=H)
    y = jax.block_until_ready(y)

    y_ref = attention_reference(x, raw_params, num_heads=H)
    assert y.shape == (L, N, E)
    # bf16 matmul operands + approx reciprocal in the softmax -> looser tolerance
    assert jnp.allclose(y, y_ref, atol=2.5e-2, rtol=2.5e-2), "mismatch vs reference"

    print("KERNEL_OK")
</pallas_src>

<mosaic_0001>
module attributes {stable_mosaic.version = 11 : i64} {
  func.func @fused_attention_kernel(%arg0: i32, %arg1: memref<1x8x32xf32, #tpu.memory_space<vmem>>, %arg2: memref<1x32xf32, #tpu.memory_space<vmem>>, %arg3: memref<1x32xf32, #tpu.memory_space<vmem>>, %arg4: memref<32x96xbf16, #tpu.memory_space<vmem>>, %arg5: memref<1x96xf32, #tpu.memory_space<vmem>>, %arg6: memref<32x32xbf16, #tpu.memory_space<vmem>>, %arg7: memref<1x32xf32, #tpu.memory_space<vmem>>, %arg8: memref<1x8x32xf32, #tpu.memory_space<vmem>>, %arg9: memref<8x32xf32, #tpu.memory_space<vmem>>) attributes {dimension_semantics = [#tpu.dimension_semantics<parallel>], iteration_bounds = array<i64: 2>, scalar_prefetch = 0 : i64, scratch_operands = 1 : i64, tpu.core_type = #tpu.core_type<tc>, window_params = [{transform_indices = @transform_0, window_bounds = array<i64: 1, 8, 32>}, {pipeline_mode = #tpu.pipeline_mode<synchronous>, transform_indices = @transform_1, window_bounds = array<i64: 1, 32>}, {pipeline_mode = #tpu.pipeline_mode<synchronous>, transform_indices = @transform_2, window_bounds = array<i64: 1, 32>}, {pipeline_mode = #tpu.pipeline_mode<synchronous>, transform_indices = @transform_3, window_bounds = array<i64: 32, 96>}, {pipeline_mode = #tpu.pipeline_mode<synchronous>, transform_indices = @transform_4, window_bounds = array<i64: 1, 96>}, {pipeline_mode = #tpu.pipeline_mode<synchronous>, transform_indices = @transform_5, window_bounds = array<i64: 32, 32>}, {pipeline_mode = #tpu.pipeline_mode<synchronous>, transform_indices = @transform_6, window_bounds = array<i64: 1, 32>}, {transform_indices = @transform_7, window_bounds = array<i64: 1, 8, 32>}]} {
    %c0 = arith.constant 0 : index
    %c0_0 = arith.constant 0 : index
    %c0_1 = arith.constant 0 : index
    %0 = vector.load %arg1[%c0, %c0_0, %c0_1] : memref<1x8x32xf32, #tpu.memory_space<vmem>>, vector<1x8x32xf32>
    %1 = vector.shape_cast %0 : vector<1x8x32xf32> to vector<8x32xf32>
    %cst = arith.constant dense<0.000000e+00> : vector<8xf32>
    %2 = vector.multi_reduction <add>, %1, %cst [1] : vector<8x32xf32> to vector<8xf32>
    %3 = vector.shape_cast %2 : vector<8xf32> to vector<8x1xf32>
    %cst_2 = arith.constant 3.200000e+01 : f32
    %4 = vector.broadcast %cst_2 : f32 to vector<8x1xf32>
    %5 = arith.divf %3, %4 : vector<8x1xf32>
    %6 = vector.broadcast %5 : vector<8x1xf32> to vector<8x32xf32>
    %7 = arith.subf %1, %6 : vector<8x32xf32>
    %8 = arith.mulf %7, %7 : vector<8x32xf32>
    %cst_3 = arith.constant dense<0.000000e+00> : vector<8xf32>
    %9 = vector.multi_reduction <add>, %8, %cst_3 [1] : vector<8x32xf32> to vector<8xf32>
    %10 = vector.shape_cast %9 : vector<8xf32> to vector<8x1xf32>
    %cst_4 = arith.constant 3.200000e+01 : f32
    %11 = vector.broadcast %cst_4 : f32 to vector<8x1xf32>
    %12 = arith.divf %10, %11 : vector<8x1xf32>
    %13 = vector.broadcast %5 : vector<8x1xf32> to vector<8x32xf32>
    %14 = arith.subf %1, %13 : vector<8x32xf32>
    %cst_5 = arith.constant 9.99999974E-6 : f32
    %15 = vector.broadcast %cst_5 : f32 to vector<8x1xf32>
    %16 = arith.addf %12, %15 : vector<8x1xf32>
    %17 = math.rsqrt %16 : vector<8x1xf32>
    %18 = vector.broadcast %17 : vector<8x1xf32> to vector<8x32xf32>
    %19 = arith.mulf %14, %18 : vector<8x32xf32>
    %c0_6 = arith.constant 0 : index
    %c0_7 = arith.constant 0 : index
    %20 = vector.load %arg2[%c0_6, %c0_7] : memref<1x32xf32, #tpu.memory_space<vmem>>, vector<1x32xf32>
    %21 = vector.broadcast %20 : vector<1x32xf32> to vector<8x32xf32>
    %22 = arith.mulf %19, %21 : vector<8x32xf32>
    %c0_8 = arith.constant 0 : index
    %c0_9 = arith.constant 0 : index
    %23 = vector.load %arg3[%c0_8, %c0_9] : memref<1x32xf32, #tpu.memory_space<vmem>>, vector<1x32xf32>
    %24 = vector.broadcast %23 : vector<1x32xf32> to vector<8x32xf32>
    %25 = arith.addf %22, %24 : vector<8x32xf32>
    %26 = arith.truncf %25 : vector<8x32xf32> to vector<8x32xbf16>
    %c0_10 = arith.constant 0 : index
    %c0_11 = arith.constant 0 : index
    %27 = vector.load %arg4[%c0_10, %c0_11] : memref<32x96xbf16, #tpu.memory_space<vmem>>, vector<32x96xbf16>
    %cst_12 = arith.constant dense<0.000000e+00> : vector<8x96xf32>
    %28 = tpu.matmul %26, %27, %cst_12 {dimension_numbers = #tpu.dot_dimension_numbers<[1], [0], [0], [1], [0, 0, 1, 1], [], []>} : vector<8x32xbf16>, vector<32x96xbf16>, vector<8x96xf32> -> vector<8x96xf32>
    %c0_13 = arith.constant 0 : index
    %c0_14 = arith.constant 0 : index
    %29 = vector.load %arg5[%c0_13, %c0_14] : memref<1x96xf32, #tpu.memory_space<vmem>>, vector<1x96xf32>
    %30 = vector.broadcast %29 : vector<1x96xf32> to vector<8x96xf32>
    %31 = arith.addf %28, %30 : vector<8x96xf32>
    %32 = vector.extract_strided_slice %31 {offsets = [0, 0], sizes = [8, 32], strides = [1, 1]} : vector<8x96xf32> to vector<8x32xf32>
    %33 = arith.truncf %32 : vector<8x32xf32> to vector<8x32xbf16>
    %34 = vector.extract_strided_slice %31 {offsets = [0, 32], sizes = [8, 32], strides = [1, 1]} : vector<8x96xf32> to vector<8x32xf32>
    %35 = arith.truncf %34 : vector<8x32xf32> to vector<8x32xbf16>
    %36 = vector.extract_strided_slice %31 {offsets = [0, 64], sizes = [8, 32], strides = [1, 1]} : vector<8x96xf32> to vector<8x32xf32>
    %37 = arith.truncf %36 : vector<8x32xf32> to vector<8x32xbf16>
    %38 = vector.extract_strided_slice %33 {offsets = [0, 0], sizes = [8, 8], strides = [1, 1]} : vector<8x32xbf16> to vector<8x8xbf16>
    %39 = vector.extract_strided_slice %35 {offsets = [0, 0], sizes = [8, 8], strides = [1, 1]} : vector<8x32xbf16> to vector<8x8xbf16>
    %40 = vector.extract_strided_slice %37 {offsets = [0, 0], sizes = [8, 8], strides = [1, 1]} : vector<8x32xbf16> to vector<8x8xbf16>
    %cst_15 = arith.constant dense<0.000000e+00> : vector<8x8xf32>
    %41 = tpu.matmul %38, %39, %cst_15 {dimension_numbers = #tpu.dot_dimension_numbers<[1], [1], [0], [0], [0, 0, 1, 0], [], []>} : vector<8x8xbf16>, vector<8x8xbf16>, vector<8x8xf32> -> vector<8x8xf32>
    %cst_16 = arith.constant dense<0xFF800000> : vector<8xf32>
    %42 = vector.multi_reduction <maximumf>, %41, %cst_16 [1] : vector<8x8xf32> to vector<8xf32>
    %43 = vector.shape_cast %42 : vector<8xf32> to vector<8x1xf32>
    %44 = vector.broadcast %43 : vector<8x1xf32> to vector<8x8xf32>
    %45 = arith.subf %41, %44 : vector<8x8xf32>
    %46 = math.exp %45 : vector<8x8xf32>
    %cst_17 = arith.constant dense<0.000000e+00> : vector<8xf32>
    %47 = vector.multi_reduction <add>, %46, %cst_17 [1] : vector<8x8xf32> to vector<8xf32>
    %48 = vector.shape_cast %47 : vector<8xf32> to vector<8x1xf32>
    %49 = arith.truncf %46 : vector<8x8xf32> to vector<8x8xbf16>
    %cst_18 = arith.constant dense<0.000000e+00> : vector<8x8xf32>
    %50 = tpu.matmul %49, %40, %cst_18 {dimension_numbers = #tpu.dot_dimension_numbers<[1], [0], [0], [1], [0, 0, 1, 1], [], []>} : vector<8x8xbf16>, vector<8x8xbf16>, vector<8x8xf32> -> vector<8x8xf32>
    %51 = tpu.reciprocal %48 {approx = true} : vector<8x1xf32> -> vector<8x1xf32>
    %52 = vector.broadcast %51 : vector<8x1xf32> to vector<8x8xf32>
    %53 = arith.mulf %50, %52 : vector<8x8xf32>
    %c0_19 = arith.constant 0 : index
    %c0_20 = arith.constant 0 : index
    %54 = vector.load %arg9[%c0_19, %c0_20] : memref<8x32xf32, #tpu.memory_space<vmem>>, vector<8x8xf32>
    tpu.vector_store %arg9[%c0_19, %c0_20], %53 {strides = array<i32>} : memref<8x32xf32, #tpu.memory_space<vmem>>, vector<8x8xf32>,
    %55 = vector.extract_strided_slice %33 {offsets = [0, 8], sizes = [8, 8], strides = [1, 1]} : vector<8x32xbf16> to vector<8x8xbf16>
    %56 = vector.extract_strided_slice %35 {offsets = [0, 8], sizes = [8, 8], strides = [1, 1]} : vector<8x32xbf16> to vector<8x8xbf16>
    %57 = vector.extract_strided_slice %37 {offsets = [0, 8], sizes = [8, 8], strides = [1, 1]} : vector<8x32xbf16> to vector<8x8xbf16>
    %cst_21 = arith.constant dense<0.000000e+00> : vector<8x8xf32>
    %58 = tpu.matmul %55, %56, %cst_21 {dimension_numbers = #tpu.dot_dimension_numbers<[1], [1], [0], [0], [0, 0, 1, 0], [], []>} : vector<8x8xbf16>, vector<8x8xbf16>, vector<8x8xf32> -> vector<8x8xf32>
    %cst_22 = arith.constant dense<0xFF800000> : vector<8xf32>
    %59 = vector.multi_reduction <maximumf>, %58, %cst_22 [1] : vector<8x8xf32> to vector<8xf32>
    %60 = vector.shape_cast %59 : vector<8xf32> to vector<8x1xf32>
    %61 = vector.broadcast %60 : vector<8x1xf32> to vector<8x8xf32>
    %62 = arith.subf %58, %61 : vector<8x8xf32>
    %63 = math.exp %62 : vector<8x8xf32>
    %cst_23 = arith.constant dense<0.000000e+00> : vector<8xf32>
    %64 = vector.multi_reduction <add>, %63, %cst_23 [1] : vector<8x8xf32> to vector<8xf32>
    %65 = vector.shape_cast %64 : vector<8xf32> to vector<8x1xf32>
    %66 = arith.truncf %63 : vector<8x8xf32> to vector<8x8xbf16>
    %cst_24 = arith.constant dense<0.000000e+00> : vector<8x8xf32>
    %67 = tpu.matmul %66, %57, %cst_24 {dimension_numbers = #tpu.dot_dimension_numbers<[1], [0], [0], [1], [0, 0, 1, 1], [], []>} : vector<8x8xbf16>, vector<8x8xbf16>, vector<8x8xf32> -> vector<8x8xf32>
    %68 = tpu.reciprocal %65 {approx = true} : vector<8x1xf32> -> vector<8x1xf32>
    %69 = vector.broadcast %68 : vector<8x1xf32> to vector<8x8xf32>
    %70 = arith.mulf %67, %69 : vector<8x8xf32>
    %c0_25 = arith.constant 0 : index
    %c8 = arith.constant 8 : index
    %71 = vector.load %arg9[%c0_25, %c8] : memref<8x32xf32, #tpu.memory_space<vmem>>, vector<8x8xf32>
    tpu.vector_store %arg9[%c0_25, %c8], %70 {strides = array<i32>} : memref<8x32xf32, #tpu.memory_space<vmem>>, vector<8x8xf32>,
    %72 = vector.extract_strided_slice %33 {offsets = [0, 16], sizes = [8, 8], strides = [1, 1]} : vector<8x32xbf16> to vector<8x8xbf16>
    %73 = vector.extract_strided_slice %35 {offsets = [0, 16], sizes = [8, 8], strides = [1, 1]} : vector<8x32xbf16> to vector<8x8xbf16>
    %74 = vector.extract_strided_slice %37 {offsets = [0, 16], sizes = [8, 8], strides = [1, 1]} : vector<8x32xbf16> to vector<8x8xbf16>
    %cst_26 = arith.constant dense<0.000000e+00> : vector<8x8xf32>
    %75 = tpu.matmul %72, %73, %cst_26 {dimension_numbers = #tpu.dot_dimension_numbers<[1], [1], [0], [0], [0, 0, 1, 0], [], []>} : vector<8x8xbf16>, vector<8x8xbf16>, vector<8x8xf32> -> vector<8x8xf32>
    %cst_27 = arith.constant dense<0xFF800000> : vector<8xf32>
    %76 = vector.multi_reduction <maximumf>, %75, %cst_27 [1] : vector<8x8xf32> to vector<8xf32>
    %77 = vector.shape_cast %76 : vector<8xf32> to vector<8x1xf32>
    %78 = vector.broadcast %77 : vector<8x1xf32> to vector<8x8xf32>
    %79 = arith.subf %75, %78 : vector<8x8xf32>
    %80 = math.exp %79 : vector<8x8xf32>
    %cst_28 = arith.constant dense<0.000000e+00> : vector<8xf32>
    %81 = vector.multi_reduction <add>, %80, %cst_28 [1] : vector<8x8xf32> to vector<8xf32>
    %82 = vector.shape_cast %81 : vector<8xf32> to vector<8x1xf32>
    %83 = arith.truncf %80 : vector<8x8xf32> to vector<8x8xbf16>
    %cst_29 = arith.constant dense<0.000000e+00> : vector<8x8xf32>
    %84 = tpu.matmul %83, %74, %cst_29 {dimension_numbers = #tpu.dot_dimension_numbers<[1], [0], [0], [1], [0, 0, 1, 1], [], []>} : vector<8x8xbf16>, vector<8x8xbf16>, vector<8x8xf32> -> vector<8x8xf32>
    %85 = tpu.reciprocal %82 {approx = true} : vector<8x1xf32> -> vector<8x1xf32>
    %86 = vector.broadcast %85 : vector<8x1xf32> to vector<8x8xf32>
    %87 = arith.mulf %84, %86 : vector<8x8xf32>
    %c0_30 = arith.constant 0 : index
    %c16 = arith.constant 16 : index
    %88 = vector.load %arg9[%c0_30, %c16] : memref<8x32xf32, #tpu.memory_space<vmem>>, vector<8x8xf32>
    tpu.vector_store %arg9[%c0_30, %c16], %87 {strides = array<i32>} : memref<8x32xf32, #tpu.memory_space<vmem>>, vector<8x8xf32>,
    %89 = vector.extract_strided_slice %33 {offsets = [0, 24], sizes = [8, 8], strides = [1, 1]} : vector<8x32xbf16> to vector<8x8xbf16>
    %90 = vector.extract_strided_slice %35 {offsets = [0, 24], sizes = [8, 8], strides = [1, 1]} : vector<8x32xbf16> to vector<8x8xbf16>
    %91 = vector.extract_strided_slice %37 {offsets = [0, 24], sizes = [8, 8], strides = [1, 1]} : vector<8x32xbf16> to vector<8x8xbf16>
    %cst_31 = arith.constant dense<0.000000e+00> : vector<8x8xf32>
    %92 = tpu.matmul %89, %90, %cst_31 {dimension_numbers = #tpu.dot_dimension_numbers<[1], [1], [0], [0], [0, 0, 1, 0], [], []>} : vector<8x8xbf16>, vector<8x8xbf16>, vector<8x8xf32> -> vector<8x8xf32>
    %cst_32 = arith.constant dense<0xFF800000> : vector<8xf32>
    %93 = vector.multi_reduction <maximumf>, %92, %cst_32 [1] : vector<8x8xf32> to vector<8xf32>
    %94 = vector.shape_cast %93 : vector<8xf32> to vector<8x1xf32>
    %95 = vector.broadcast %94 : vector<8x1xf32> to vector<8x8xf32>
    %96 = arith.subf %92, %95 : vector<8x8xf32>
    %97 = math.exp %96 : vector<8x8xf32>
    %cst_33 = arith.constant dense<0.000000e+00> : vector<8xf32>
    %98 = vector.multi_reduction <add>, %97, %cst_33 [1] : vector<8x8xf32> to vector<8xf32>
    %99 = vector.shape_cast %98 : vector<8xf32> to vector<8x1xf32>
    %100 = arith.truncf %97 : vector<8x8xf32> to vector<8x8xbf16>
    %cst_34 = arith.constant dense<0.000000e+00> : vector<8x8xf32>
    %101 = tpu.matmul %100, %91, %cst_34 {dimension_numbers = #tpu.dot_dimension_numbers<[1], [0], [0], [1], [0, 0, 1, 1], [], []>} : vector<8x8xbf16>, vector<8x8xbf16>, vector<8x8xf32> -> vector<8x8xf32>
    %102 = tpu.reciprocal %99 {approx = true} : vector<8x1xf32> -> vector<8x1xf32>
    %103 = vector.broadcast %102 : vector<8x1xf32> to vector<8x8xf32>
    %104 = arith.mulf %101, %103 : vector<8x8xf32>
    %c0_35 = arith.constant 0 : index
    %c24 = arith.constant 24 : index
    %105 = vector.load %arg9[%c0_35, %c24] : memref<8x32xf32, #tpu.memory_space<vmem>>, vector<8x8xf32>
    tpu.vector_store %arg9[%c0_35, %c24], %104 {strides = array<i32>} : memref<8x32xf32, #tpu.memory_space<vmem>>, vector<8x8xf32>,
    %c0_36 = arith.constant 0 : index
    %c0_37 = arith.constant 0 : index
    %106 = vector.load %arg9[%c0_36, %c0_37] : memref<8x32xf32, #tpu.memory_space<vmem>>, vector<8x32xf32>
    %107 = arith.truncf %106 : vector<8x32xf32> to vector<8x32xbf16>
    %c0_38 = arith.constant 0 : index
    %c0_39 = arith.constant 0 : index
    %108 = vector.load %arg6[%c0_38, %c0_39] : memref<32x32xbf16, #tpu.memory_space<vmem>>, vector<32x32xbf16>
    %cst_40 = arith.constant dense<0.000000e+00> : vector<8x32xf32>
    %109 = tpu.matmul %107, %108, %cst_40 {dimension_numbers = #tpu.dot_dimension_numbers<[1], [0], [0], [1], [0, 0, 1, 1], [], []>} : vector<8x32xbf16>, vector<32x32xbf16>, vector<8x32xf32> -> vector<8x32xf32>
    %c0_41 = arith.constant 0 : index
    %c0_42 = arith.constant 0 : index
    %110 = vector.load %arg7[%c0_41, %c0_42] : memref<1x32xf32, #tpu.memory_space<vmem>>, vector<1x32xf32>
    %111 = vector.broadcast %110 : vector<1x32xf32> to vector<8x32xf32>
    %112 = arith.addf %109, %111 : vector<8x32xf32>
    %113 = vector.shape_cast %112 : vector<8x32xf32> to vector<1x8x32xf32>
    %c0_43 = arith.constant 0 : index
    %c0_44 = arith.constant 0 : index
    %c0_45 = arith.constant 0 : index
    %114 = vector.load %arg8[%c0_43, %c0_44, %c0_45] : memref<1x8x32xf32, #tpu.memory_space<vmem>>, vector<1x8x32xf32>
    tpu.vector_store %arg8[%c0_43, %c0_44, %c0_45], %113 {strides = array<i32>} : memref<1x8x32xf32, #tpu.memory_space<vmem>>, vector<1x8x32xf32>,
    return
  }
  func.func @transform_0(%arg0: i32) -> (i32, i32, i32) {
    %c0_i32 = arith.constant 0 : i32
    %c0_i32_0 = arith.constant 0 : i32
    %c0_i32_1 = arith.constant 0 : i32
    return %arg0, %c0_i32, %c0_i32_0 : i32, i32, i32
  }
  func.func @transform_1(%arg0: i32) -> (i32, i32) {
    %c0_i32 = arith.constant 0 : i32
    %c0_i32_0 = arith.constant 0 : i32
    %c0_i32_1 = arith.constant 0 : i32
    return %c0_i32, %c0_i32_0 : i32, i32
  }
  func.func @transform_2(%arg0: i32) -> (i32, i32) {
    %c0_i32 = arith.constant 0 : i32
    %c0_i32_0 = arith.constant 0 : i32
    %c0_i32_1 = arith.constant 0 : i32
    return %c0_i32, %c0_i32_0 : i32, i32
  }
  func.func @transform_3(%arg0: i32) -> (i32, i32) {
    %c0_i32 = arith.constant 0 : i32
    %c0_i32_0 = arith.constant 0 : i32
    %c0_i32_1 = arith.constant 0 : i32
    return %c0_i32, %c0_i32_0 : i32, i32
  }
  func.func @transform_4(%arg0: i32) -> (i32, i32) {
    %c0_i32 = arith.constant 0 : i32
    %c0_i32_0 = arith.constant 0 : i32
    %c0_i32_1 = arith.constant 0 : i32
    return %c0_i32, %c0_i32_0 : i32, i32
  }
  func.func @transform_5(%arg0: i32) -> (i32, i32) {
    %c0_i32 = arith.constant 0 : i32
    %c0_i32_0 = arith.constant 0 : i32
    %c0_i32_1 = arith.constant 0 : i32
    return %c0_i32, %c0_i32_0 : i32, i32
  }
  func.func @transform_6(%arg0: i32) -> (i32, i32) {
    %c0_i32 = arith.constant 0 : i32
    %c0_i32_0 = arith.constant 0 : i32
    %c0_i32_1 = arith.constant 0 : i32
    return %c0_i32, %c0_i32_0 : i32, i32
  }
  func.func @transform_7(%arg0: i32) -> (i32, i32, i32) {
    %c0_i32 = arith.constant 0 : i32
    %c0_i32_0 = arith.constant 0 : i32
    %c0_i32_1 = arith.constant 0 : i32
    return %arg0, %c0_i32, %c0_i32_0 : i32, i32, i32
  }
}

</mosaic_0001>

<bundles_post_ra>
// kernel: attention_forward.1
= control target key start
LH: loop header
LB: loop body
LE: loop exit
PB: predicated region body
PF: predicated region fallthrough
CT: control target
= control target key end

     0   :  { %12 = vsyncpa [#allocation4], 0  ;;  %s1249_s24 = smov 0   ;;  %s1384_s0 = inlined_call_operand.vmem [shape: f32[2,8,32], index: 0, kind: input, shape index: {}]   ;;  %s1385_s1 = inlined_call_operand.vmem [shape: f32[1,32], index: 1, kind: input, shape index: {}]   ;;  %s1386_s2 = inlined_call_operand.vmem [shape: f32[1,32], index: 2, kind: input, shape index: {}]   ;;  %s1387_s3 = inlined_call_operand.vmem [shape: bf16[32,96], index: 3, kind: input, shape index: {}]   ;;  %s1388_s4 = inlined_call_operand.hbm [shape: f32[1,96], index: 4, kind: input, shape index: {}]   ;;  %s1389_s5 = inlined_call_operand.vmem [shape: bf16[32,32], index: 5, kind: input, shape index: {}]   ;;  %s1390_s6 = inlined_call_operand.vmem [shape: f32[1,32], index: 6, kind: input, shape index: {}]   ;;  %s1391_s7 = inlined_call_operand.vmem [shape: f32[2,8,32], index: 7, kind: output, shape index: {}]  }
   0x1 LB: > { %s982_s25 = sadd.s32 4294967295, %s1190_s24   ;;  %p984_p0 = scmp.ge.s32.totalorder %s1190_s24, 1  ;;  %s1190_s24 = sphi %s1249_s24, %s18_s24  }
   0x2   : > { %p201_p1 = scmp.lt.s32.totalorder %s1190_s24, 3  ;;  %p1105_p3 = scmp.eq.s32.totalorder %s982_s25, 0 }
   0x3   : > { %s1192_s27 = smov [#allocation3]  }
   0x4   : > { %p1257_p2 = pnand %p984_p0, %p201_p1  ;;  %s223_s28 = sshll.u32 %s1192_s27, 4  ;;  %s224_s28 = int_to_ptr.vmem [resolvable:$true] %s223_s28 }
   0x5   : > { %s1165_s29 = scalar_lea.vmem %s224_s28, 16  ;;  %s1172_s30 = scalar_lea.vmem %s224_s28, 32 }
   0x6   : > { %p1101_p4 = pneg %p1257_p2  ;;  %p1166_p7 = scmp.ne.s32.totalorder %s224_s28, %s1165_s29 }
   0x7   : > { %p1173_p10 = scmp.lt.s32.totalorder %s224_s28, %s224_s28  ;;  %p1174_p11 = scmp.lt.s32.totalorder %s1172_s30, %s1165_s29 }
   0x8   : > { %p1102_p5 = pnand %p1105_p3, %p1101_p4 }
   0x9   : > { %p1175_p12 = por %p1174_p11, %p1173_p10 }
   0xa   : > { %p1156_p6 = pneg %p1102_p5 }
   0xc   : > { %p1168_p8 = pnand %p1166_p7, %p1156_p6 }
   0xe   : > { %p1169_p9 = pneg %p1168_p8 }
  0x10   : > { %p1176_p13 = pnand %p1175_p12, %p1169_p9 }
  0x12   : > { %1179 = shalt.err (!%p1176_p13)
}
  0x13   : > { %1104 = dma.hbm_to_vmem [thread:$0]  (!%p1102_p5), %s1388_s4, 16, %s224_s28, [#allocation4]  }
  0x14   : > { %249 = sbr.rel (%p1257_p2) target bundleno = 1594 (0x63a), region = 48 }
  0x19   : > { %1185 = dma.done.wait (%p1105_p3), [#allocation4], 16  }
  0x1a   : > { %1187 = vsyncadd (%p1105_p3), [#allocation4], 4294967280  ;;  %p279_p0 = scmp.lt.s32.totalorder %s982_s25, 1  ;;  %vm289_vm0 = vcmask 261120   ;;  %v1132_v7 = vld [vmem:[%s1387_s3 + $0x8] sm:$0xff]   ;;  %v1193_v8 = vmov 0.0  }
  0x1b   : > { %1033 = vmatprep.subr.bf16.mxu0 %v1193_v8  ;;  %vm1194_vm1 = vmmov 0   ;;  %v1133_v9 = vld [vmem:[%s1387_s3] sm:$0xff]   ;;  %1041 = vmatprep.subr.bf16.mxu1 %v1193_v8  ;;  %v993_v20 = vld [vmem:[#allocation3] ss:$0 sm:$0xff]  ;;  %s1195_s22 = smov 120   ;;  %s1196_s23 = smov 96  }
  0x1c   : > { %s1394_s25 = smov (!%p279_p0, %s982_s25), 1  ;;  %1037 = vmatprep.mubr.msk.bf16.mxu0 %vm1194_vm1, %v1193_v8  ;;  %1034 = vmatpush3.bf16.msra.mxu0 %v1132_v7  ;;  %v991_v14 = vld [vmem:[%s1385_s1] ss:$0 sm:$0xff]  ;;  %s1197_s26 = smov 88   ;;  %vm391_vm2 = vcmask 64512   ;;  %vm453_vm3 = vcmask 1043456  }
  0x1d   : > { %s989_s10 = sshll.u32 %s1394_s25, 3  ;;  %1035 = vmatprep.subr.bf16.mxu0 %v1193_v8  ;;  %1043 = vmatprep.mubr.msk.bf16.mxu1 %vm1194_vm1, %v1193_v8  ;;  %v992_v16 = vld [vmem:[%s1386_s2] ss:$0 sm:$0xff]  ;;  %s1198_s27 = smov 80   ;;  %vm614_vm4 = vcmask 130112   ;;  %vm730_vm5 = vcmask 195712  }
  0x1e   : > { %s282_s13 = scalar_lea.vmem %s1384_s0, %s989_s10  ;;  %s1199_s28 = smov 112   ;;  %vm846_vm6 = vcmask 261312  }
  0x1f   : > { %v288_v0 = vld [vmem:[%s282_s13] sm:$0xff]  ;;  %s1200_s29 = smov 72   ;;  %s1201_s30 = smov 104  }
  0x20   : > { %v290_v1 = vsel %vm289_vm0, %v288_v0, 0.0  ;;  %1036 = vmatpush3.bf16.msra.mxu0 %v1133_v9  ;;  %s1202_s8 = smov 64   ;;  %s1203_s9 = smov 56  }
  0x21   : > { %291 = vadd.xlane.f32.xlu0 %v290_v1  ;;  %1047 = vmatprep.subr.bf16.mxu0 %v1193_v8  ;;  %s1204_s11 = smov 48   ;;  %s1205_s12 = smov 40  }
  0x22   : > { %s1206_s13 = smov 8   ;;  %s1207_s18 = smov 16  }
  0x23   : > { %s1208_s19 = smov 24  }
  0xaa   : > { %v292_v2 = vpop.xlane.xlu0 %291 }
  0xab   : > { %v294_v3 = vmul.f32 0.03125, %v292_v2 }
  0xad   : > { %v295_v4 = vsub.f32 %v288_v0, %v294_v3 }
  0xaf   : > { %v296_v5 = vmul.f32 %v295_v4, %v295_v4 }
  0xb1   : > { %v297_v6 = vsel %vm289_vm0, %v296_v5, 0.0 }
  0xb2   : > { %298 = vadd.xlane.f32.xlu0 %v297_v6 }
 0x13b   : > { %v299_v10 = vpop.xlane.xlu0 %298 }
 0x13c   : > { %v300_v11 = vmul.f32 0.03125, %v299_v10 }
 0x13e   : > { %v301_v12 = vadd.f32 1e-05, %v300_v11 }
 0x140   : > { %1136 = vrsqrt.f32 %v301_v12 }
 0x14d   : > { %v1137_v13 = vpop.eup %1136 }
 0x14e   : > { %v303_v15 = vmul.f32 %v1137_v13, %v295_v4 }
 0x150   : > { %v311_v17 = vmul.f32 %v991_v14, %v303_v15 }
 0x152   : > { %v319_v18 = vadd.f32 %v992_v16, %v311_v17 }
 0x154   : > { %v320_v19 = vpack.c.bf16 %v319_v18, %v319_v18 }
 0x156   : > { %1038 = vmatmul.mubr.msk.bf16.vlgmr.msra.gmra.mxu0 %vm289_vm0, %v320_v19 }
 0x157   : > { %1049 = vmatprep.mubr.msk.bf16.mxu0 %vm1194_vm1, %v1193_v8 }
 0x216   : > { %v381_v21 = vpop.f32.mrf.mxu0 }
 0x217   : > { %v382_v22 = vadd.f32 %v993_v20, %v381_v21 }
 0x218   : > { %v1039_v23 = vpop.f32.mrf.mxu0 }
 0x219   : > { %v1304_v24 = vpack.c.bf16 %v382_v22, %v382_v22 }
 0x21a   : > { %v384_v25 = vpop.f32.mrf.mxu0 }
 0x21b   : > { %500 = vrot.lane.b32.xlu0 %v1304_v24, %s1195_s22  ;;  %389 = vrot.lane.b32.xlu1 %v1304_v24, %s1196_s23 }
 0x21c   : > { %v1040_v26 = vpop.f32.mrf.mxu0 }
 0x21f   : > { %502 = vrot.lane.b32.xlu1 %v1304_v24, %s1197_s26  ;;  %s286_s26 = scalar_lea.vmem %s1391_s7, %s989_s10 }
 0x223   : > { %618 = vrot.lane.b32.xlu1 %v1304_v24, %s1198_s27 }
 0x227   : > { %616 = vrot.lane.b32.xlu1 %v1304_v24, %s1199_s28 }
 0x22b   : > { %734 = vrot.lane.b32.xlu1 %v1304_v24, %s1200_s29 }
 0x22f   : > { %732 = vrot.lane.b32.xlu1 %v1304_v24, %s1201_s30 }
 0x28d   : > { %v390_v27 = vpop.permute.xlu1 %389  ;;  %v501_v32 = vpop.permute.xlu0 %500 }
 0x28e   : > { %v396_v28 = vsel %vm391_vm2, %v390_v27, 0 }
 0x28f   : > { %1042 = vmatpush3.bf16.xpose.msra.mxu1 %v396_v28 }
 0x290   : > { %1053 = vmatprep.subr.bf16.mxu1 %v1193_v8 }
 0x291   : > { %v503_v29 = vpop.permute.xlu1 %502 }
 0x292   : > { %v508_v30 = vsel %vm391_vm2, %v503_v29, 0 }
 0x295   : > { %v619_v31 = vpop.permute.xlu1 %618 }
 0x296   : > { %1044 = vmatmul.mubr.msk.bf16.vlgmr.msra.gmra.mxu1 %vm391_vm2, %v1304_v24  ;;  %v624_v34 = vsel %vm391_vm2, %v619_v31, 0 }
 0x297   : > { %1054 = vmatpush3.bf16.xpose.msra.mxu1 %v508_v30  ;;  %1055 = vmatprep.mubr.msk.bf16.mxu1 %vm1194_vm1, %v1193_v8 }
 0x298   : > { %1065 = vmatprep.subr.bf16.mxu1 %v1193_v8 }
 0x299   : > { %v617_v33 = vpop.permute.xlu1 %616 }
 0x29d   : > { %v735_v35 = vpop.permute.xlu1 %734 }
 0x29e   : > { %1056 = vmatmul.mubr.msk.bf16.vlgmr.msra.gmra.mxu1 %vm391_vm2, %v501_v32  ;;  %v740_v36 = vsel %vm391_vm2, %v735_v35, 0 }
 0x29f   : > { %1066 = vmatpush3.bf16.xpose.msra.mxu1 %v624_v34  ;;  %1067 = vmatprep.mubr.msk.bf16.mxu1 %vm1194_vm1, %v1193_v8 }
 0x2a0   : > { %1077 = vmatprep.subr.bf16.mxu1 %v1193_v8 }
 0x2a1   : > { %v733_v37 = vpop.permute.xlu1 %732 }
 0x2a6   : > { %1068 = vmatmul.mubr.msk.bf16.vlgmr.msra.gmra.mxu1 %vm391_vm2, %v617_v33 }
 0x2a7   : > { %1078 = vmatpush3.bf16.xpose.msra.mxu1 %v740_v36  ;;  %1079 = vmatprep.mubr.msk.bf16.mxu1 %vm1194_vm1, %v1193_v8 }
 0x2a8   : > { %1089 = vmatprep.subr.bf16.mxu1 %v1193_v8 }
 0x2ae   : > { %1080 = vmatmul.mubr.msk.bf16.vlgmr.msra.gmra.mxu1 %vm391_vm2, %v733_v37 }
 0x2af   : > { %1093 = vmatprep.mubr.msk.bf16.mxu1 %vm1194_vm1, %v1193_v8 }
 0x356   : > { %v432_v38 = vpop.f32.mrf.mxu1 }
 0x357   : > { %v438_v39 = vsel %vm391_vm2, %v432_v38, -inf }
 0x358   : > { %439 = vmax.xlane.f32.xlu1 %v438_v39  ;;  %v1045_v40 = vpop.f32.mrf.mxu1 }
 0x35a   : > { %v435_v41 = vpop.f32.mrf.mxu1 }
 0x35c   : > { %v1046_v42 = vpop.f32.mrf.mxu1 }
 0x35e   : > { %v544_v43 = vpop.f32.mrf.mxu1 }
 0x35f   : > { %v550_v44 = vsel %vm391_vm2, %v544_v43, -inf }
 0x360   : > { %551 = vmax.xlane.f32.xlu0 %v550_v44  ;;  %v1057_v45 = vpop.f32.mrf.mxu1 }
 0x362   : > { %v547_v46 = vpop.f32.mrf.mxu1 }
 0x363   : > { %v1135_v46 = vld [vmem:[%s1389_s5] sm:$0xff]  }
 0x364   : > { %v1058_v47 = vpop.f32.mrf.mxu1 }
 0x366   : > { %v660_v48 = vpop.f32.mrf.mxu1 }
 0x367   : > { %v666_v57 = vsel %vm391_vm2, %v660_v48, -inf }
 0x368   : > { %v1069_v49 = vpop.f32.mrf.mxu1 }
 0x369   : > { %448 = vrot.lane.b32.xlu1 %v1304_v24, %s1202_s8 }
 0x36a   : > { %v663_v50 = vpop.f32.mrf.mxu1 }
 0x36c   : > { %v1070_v51 = vpop.f32.mrf.mxu1 }
 0x36e   : > { %v776_v52 = vpop.f32.mrf.mxu1 }
 0x36f   : > { %v782_v53 = vsel %vm391_vm2, %v776_v52, -inf }
 0x370   : > { %783 = vmax.xlane.f32.xlu0 %v782_v53  ;;  %v1081_v54 = vpop.f32.mrf.mxu1 }
 0x372   : > { %v779_v55 = vpop.f32.mrf.mxu1 }
 0x374   : > { %v1082_v56 = vpop.f32.mrf.mxu1 }
 0x386   : > { %560 = vrot.lane.b32.xlu0 %v1304_v24, %s1203_s9 }
 0x38d   : > { %667 = vmax.xlane.f32.xlu1 %v666_v57 }
 0x39e   : > { %676 = vrot.lane.b32.xlu1 %v1304_v24, %s1204_s11 }
 0x3a2   : > { %792 = vrot.lane.b32.xlu1 %v1304_v24, %s1205_s12 }
 0x3e1   : > { %v440_v58 = vpop.xlane.xlu1 %439 }
 0x3e2   : > { %v441_v59 = vsub.f32 %v432_v38, %v440_v58 }
 0x3e4   : > { %v442_v60 = vmul.f32 1.442695, %v441_v59 }
 0x3e5   : > { %v449_v61 = vpop.permute.xlu1 %448 }
 0x3e6   : > { %1138 = vpow2.f32 %v442_v60  ;;  %v455_v62 = vsel %vm453_vm3, %v449_v61, 0  ;;  %v1005_v61 = vld [vmem:[%s1390_s6] ss:$0 sm:$0xff] }
 0x3e7   : > { %1048 = vmatpush3.bf16.msra.mxu0 %v455_v62 }
 0x3e8   : > { %1059 = vmatprep.subr.bf16.mxu0 %v1193_v8 }
 0x3e9   : > { %v552_v63 = vpop.xlane.xlu0 %551 }
 0x3ea   : > { %v553_v0 = vsub.f32 %v544_v43, %v552_v63  ;;  %v1134_v43 = vld [vmem:[%s1389_s5 + $0x8] sm:$0xff]  }
 0x3eb   : > { %1090 = vmatpush3.bf16.msra.mxu1 %v1134_v43 }
 0x3ec   : > { %v554_v1 = vmul.f32 1.442695, %v553_v0  ;;  %1091 = vmatprep.subr.bf16.mxu1 %v1193_v8 }
 0x3ee   : > { %1140 = vpow2.f32 %v554_v1 }
 0x3ef   : > { %1092 = vmatpush3.bf16.msra.mxu1 %v1135_v46 }
 0x3f3   : > { %v1139_v2 = vpop.eup %1138 }
 0x3f4   : > { %v447_v3 = vpack.c.bf16 %v1139_v2, %v1139_v2  ;;  %v444_v15 = vsel %vm391_vm2, %v1139_v2, 0.0 }
 0x3f6   : > { %1050 = vmatmul.mubr.msk.bf16.vlgmr.msra.gmra.mxu0 %vm391_vm2, %v447_v3 }
 0x3f7   : > { %1061 = vmatprep.mubr.msk.bf16.mxu0 %vm1194_vm1, %v1193_v8 }
 0x3f9   : > { %v784_v4 = vpop.xlane.xlu0 %783 }
 0x3fa   : > { %v785_v5 = vsub.f32 %v776_v52, %v784_v4 }
 0x3fb   : > { %v1141_v6 = vpop.eup %1140 }
 0x3fc   : > { %v786_v7 = vmul.f32 1.442695, %v785_v5  ;;  %v556_v9 = vsel %vm391_vm2, %v1141_v6, 0.0  ;;  %v559_v12 = vpack.c.bf16 %v1141_v6, %v1141_v6 }
 0x3fd   : > { %557 = vadd.xlane.f32.xlu0 %v556_v9  ;;  %v561_v10 = vpop.permute.xlu0 %560 }
 0x3fe   : > { %1142 = vpow2.f32 %v786_v7  ;;  %v566_v11 = vsel %vm453_vm3, %v561_v10, 0 }
 0x3ff   : > { %1060 = vmatpush3.bf16.msra.mxu0 %v566_v11 }
 0x400   : > { %1071 = vmatprep.subr.bf16.mxu0 %v1193_v8 }
 0x402   : > { %1062 = vmatmul.mubr.msk.bf16.vlgmr.msra.gmra.mxu0 %vm391_vm2, %v559_v12 }
 0x403   : > { %1073 = vmatprep.mubr.msk.bf16.mxu0 %vm1194_vm1, %v1193_v8 }
 0x40b   : > { %v1143_v13 = vpop.eup %1142 }
 0x40c   : > { %v788_v14 = vsel %vm391_vm2, %v1143_v13, 0.0  ;;  %v791_v26 = vpack.c.bf16 %v1143_v13, %v1143_v13 }
 0x40d   : > { %789 = vadd.xlane.f32.xlu0 %v788_v14 }
 0x411   : > { %445 = vadd.xlane.f32.xlu0 %v444_v15 }
 0x416   : > { %v668_v16 = vpop.xlane.xlu1 %667 }
 0x417   : > { %v669_v17 = vsub.f32 %v660_v48, %v668_v16 }
 0x419   : > { %v670_v18 = vmul.f32 1.442695, %v669_v17 }
 0x41a   : > { %v677_v19 = vpop.permute.xlu1 %676 }
 0x41b   : > { %1144 = vpow2.f32 %v670_v18  ;;  %v682_v20 = vsel %vm453_vm3, %v677_v19, 0 }
 0x41c   : > { %1072 = vmatpush3.bf16.msra.mxu0 %v682_v20 }
 0x41d   : > { %1083 = vmatprep.subr.bf16.mxu0 %v1193_v8 }
 0x41e   : > { %v793_v22 = vpop.permute.xlu1 %792 }
 0x41f   : > { %v798_v25 = vsel %vm453_vm3, %v793_v22, 0 }
 0x428   : > { %v1145_v21 = vpop.eup %1144 }
 0x429   : > { %v672_v23 = vsel %vm391_vm2, %v1145_v21, 0.0  ;;  %v675_v24 = vpack.c.bf16 %v1145_v21, %v1145_v21 }
 0x42a   : > { %673 = vadd.xlane.f32.xlu1 %v672_v23 }
 0x42b   : > { %1074 = vmatmul.mubr.msk.bf16.vlgmr.msra.gmra.mxu0 %vm391_vm2, %v675_v24 }
 0x42c   : > { %1084 = vmatpush3.bf16.msra.mxu0 %v798_v25  ;;  %1085 = vmatprep.mubr.msk.bf16.mxu0 %vm1194_vm1, %v1193_v8 }
 0x433   : > { %1086 = vmatmul.mubr.msk.bf16.vlgmr.msra.gmra.mxu0 %vm391_vm2, %v791_v26 }
 0x486   : > { %v558_v27 = vpop.xlane.xlu0 %557 }
 0x496   : > { %v790_v28 = vpop.xlane.xlu0 %789 }
 0x49a   : > { %v446_v29 = vpop.xlane.xlu0 %445 }
 0x49b   : > { %1146 = vrcp.f32 %v446_v29 }
 0x49c   : > { %1148 = vrcp.f32 %v558_v27 }
 0x4a8   : > { %v1147_v30 = vpop.eup %1146 }
 0x4a9   : > { %v1149_v36 = vpop.eup %1148 }
 0x4b3   : > { %v674_v42 = vpop.xlane.xlu1 %673 }
 0x4b4   : > { %1150 = vrcp.f32 %v674_v42 }
 0x4b5   : > { %1152 = vrcp.f32 %v790_v28 }
 0x4b6   : > { %v491_v31 = vpop.f32.mrf.mxu0 }
 0x4b7   : > { %v498_v32 = vmul.f32 %v1147_v30, %v491_v31 }
 0x4b8   : > { %v1051_v33 = vpop.f32.mrf.mxu0 }
 0x4b9   : > { %499 = vst.msk [vmem:[#allocation2] sm:$0xff] %vm391_vm2, %v498_v32 }
 0x4ba   : > { %v494_v34 = vpop.f32.mrf.mxu0 }
 0x4bc   : > { %v1052_v35 = vpop.f32.mrf.mxu0 }
 0x4c1   : > { %v1151_v44 = vpop.eup %1150 }
 0x4c2   : > { %v602_v37 = vpop.f32.mrf.mxu0  ;;  %v1153_v51 = vpop.eup %1152 }
 0x4c3   : > { %v609_v38 = vmul.f32 %v1149_v36, %v602_v37 }
 0x4c4   : > { %v1063_v39 = vpop.f32.mrf.mxu0 }
 0x4c5   : > { %611 = vrot.lane.b32.xlu1 %v609_v38, %s1206_s13 }
 0x4c6   : > { %v605_v40 = vpop.f32.mrf.mxu0 }
 0x4c8   : > { %v1064_v41 = vpop.f32.mrf.mxu0 }
 0x4eb   : > { %v718_v45 = vpop.f32.mrf.mxu0 }
 0x4ec   : > { %v725_v47 = vmul.f32 %v1151_v44, %v718_v45 }
 0x4ed   : > { %v1075_v48 = vpop.f32.mrf.mxu0 }
 0x4ee   : > { %727 = vrot.lane.b32.xlu0 %v725_v47, %s1207_s18 }
 0x4ef   : > { %v721_v49 = vpop.f32.mrf.mxu0 }
 0x4f1   : > { %v1076_v50 = vpop.f32.mrf.mxu0 }
 0x4f3   : > { %v834_v52 = vpop.f32.mrf.mxu0 }
 0x4f4   : > { %v841_v53 = vmul.f32 %v1153_v51, %v834_v52 }
 0x4f5   : > { %v1087_v54 = vpop.f32.mrf.mxu0 }
 0x4f6   : > { %843 = vrot.lane.b32.xlu1 %v841_v53, %s1208_s19 }
 0x4f7   : > { %v837_v55 = vpop.f32.mrf.mxu0 }
 0x4f9   : > { %v1088_v56 = vpop.f32.mrf.mxu0 }
 0x537   : > { %v612_v57 = vpop.permute.xlu1 %611 }
 0x538   : > { %615 = vst.msk [vmem:[#allocation2] sm:$0xff] %vm614_vm4, %v612_v57 }
 0x560   : > { %v728_v8 = vpop.permute.xlu0 %727 }
 0x561   : > { %731 = vst.msk [vmem:[#allocation2] sm:$0xff] %vm730_vm5, %v728_v8 }
 0x568   : > { %v844_v58 = vpop.permute.xlu1 %843 }
 0x569   : > { %847 = vst.msk [vmem:[#allocation2] sm:$0xff] %vm846_vm6, %v844_v58 }
 0x570   : > { %v848_v59 = vld [vmem:[#allocation2] sm:$0xff] }
 0x571   : > { %v849_v60 = vpack.c.bf16 %v848_v59, %v848_v59 }
 0x573   : > { %1094 = vmatmul.mubr.msk.bf16.vlgmr.msra.gmra.mxu1 %vm289_vm0, %v849_v60 }
 0x633   : > { %v910_v62 = vpop.f32.mrf.mxu1 }
 0x634   : > { %v911_v63 = vadd.f32 %v1005_v61, %v910_v62 }
 0x635   : > { %v1095_v0 = vpop.f32.mrf.mxu1 }
 0x636   : > { %916 = vst.msk [vmem:[%s286_s26] sm:$0xff] %vm289_vm0, %v911_v63 }
 0x637   : > { %v913_v1 = vpop.f32.mrf.mxu1 }
 0x639   : > { %v1096_v2 = vpop.f32.mrf.mxu1 }
 0x63a PF: > { %s18_s24 = sadd.s32 1, %s1190_s24  }
 0x63b   : > { %p15_p1 = scmp.ge.s32.totalorder %s18_s24, 4  }
 0x63d   :  { %17 = sbr.rel (!%p15_p1) target bundleno = 1 (0x1), region = 83 }
 0x642   :  { %936 = vsyncpa [#allocation4], 1 }
 0x643   :  { %938 = vsyncpa [#allocation4 + $0x1], 1 }

</bundles_post_ra>
